<compile_context>
chip_gen: v6e
topology: v6e:2x2x1
jax: 0.10.0
libtpu: 0.0.40
codegen_flags: <defaults>
</compile_context>

<pallas_src>
import jax
import jax.numpy as jnp
from jax.experimental import pallas as pl
from jax.experimental.pallas import tpu as pltpu


_LANE = 128
_TILE_ROWS_CAP = 4096            # rows/tile: 2 MiB f32 (1 MiB bf16) per input tile
_VMEM_LIMIT = 32 * 1024 * 1024   # scoped-VMEM budget (v6e/v7x default; raises v5e)


def _cdiv(a, b):
    return -(-a // b)


def _round_up(a, b):
    return _cdiv(a, b) * b


def _make_dice_kernel(n_valid_rows, tile_rows, ragged):
    """Per-sample dice kernel, closed over static tiling parameters."""

    def kernel(fake_ref, real_ref, out_ref, acc_xy_ref, acc_sq_ref):
        k = pl.program_id(1)

        @pl.when(k == 0)
        def _init():
            acc_xy_ref[...] = jnp.zeros_like(acc_xy_ref)
            acc_sq_ref[...] = jnp.zeros_like(acc_sq_ref)

        x = fake_ref[0].astype(jnp.float32)   # (TR, 128)  "input" of dice_loss
        y = real_ref[0].astype(jnp.float32)   # (TR, 128)  "target"

        if ragged:
            # The last block sticks past the array: rows >= n_valid_rows hold
            # undefined Pallas block padding -> zero them (dice-neutral).
            rows = (jax.lax.broadcasted_iota(jnp.int32, (tile_rows, 1), 0)
                    + k * tile_rows)
            valid = rows < n_valid_rows
            x = jnp.where(valid, x, 0.0)
            y = jnp.where(valid, y, 0.0)

        # Hot loop: pure elementwise VALU work folded down to one (8,128)
        # vreg per accumulator.  The reshape splits the sublane-major axis on
        # an (8,128) tile boundary (free); sum(axis=0) is plain vreg adds.
        g = tile_rows // 8
        pxy = (x * y).reshape(g, 8, _LANE)
        psq = (x * x + y * y).reshape(g, 8, _LANE)
        acc_xy_ref[...] += jnp.sum(pxy, axis=0)
        acc_sq_ref[...] += jnp.sum(psq, axis=0)

        @pl.when(k == pl.num_programs(1) - 1)
        def _epilogue():
            # Sublane-reduce first, then the single cross-lane reduce.
            sxy = jnp.sum(jnp.sum(acc_xy_ref[...], axis=0, keepdims=True),
                          axis=1, keepdims=True)                      # (1, 1)
            ssq = jnp.sum(jnp.sum(acc_sq_ref[...], axis=0, keepdims=True),
                          axis=1, keepdims=True)                      # (1, 1)
            dice = (2.0 * sxy) / (ssq + 1e-16)
            loss = -jnp.log(dice + 1e-16)
            out_ref[...] = jnp.broadcast_to(loss, out_ref.shape)

    return kernel


def dice_criterion(fake_segm, real_segm, weight):
    """Pallas implementation of Criterion.forward.

    Args:
      fake_segm: (B, C, H, W) array ("input" of dice_loss), any float dtype.
      real_segm: (B, C, H, W) array ("target"), same shape/dtype.
      weight:    python float, Criterion.__init__ loss weight.

    Returns:
      dict(dice=scalar float32 loss), matching loss_G_dict.
    """
    assert fake_segm.shape == real_segm.shape
    B = fake_segm.shape[0]
    N = 1
    for d in fake_segm.shape[1:]:
        N *= d

    itemsize = jnp.dtype(fake_segm.dtype).itemsize
    sub = max(8, 32 // itemsize)      # sublane pack: 8 f32, 16 bf16, 32 int8/fp8

    # Lane-dense per-sample view: (R, 128) rows, R a multiple of the sublane pack.
    R = _round_up(_cdiv(N, _LANE), sub)
    N_view = R * _LANE

    # Row tiling: never round R up to a whole tile; at most one partial
    # (in-kernel masked) last block per sample.
    n_chunks = _cdiv(R, _TILE_ROWS_CAP)
    TR = min(_round_up(_cdiv(R, n_chunks), sub), R)
    n_chunks = _cdiv(R, TR)
    ragged = (R % TR) != 0

    def prep(x):
        x = jnp.reshape(x, (B, N))                 # free (contiguous flatten)
        if N_view != N:
            # TODO(synk): only taken when C*H*W is not a multiple of sub*128;
            # this pad is the one remaining full HBM copy (a true zero-copy
            # path would need manual ANY-space DMA of the ragged tail).
            x = jnp.pad(x, ((0, 0), (0, N_view - N)))
        return jnp.reshape(x, (B, R, _LANE))       # free bitcast when no pad

    fake_r = prep(fake_segm)
    real_r = prep(real_segm)

    cost = pl.CostEstimate(
        flops=6 * B * N_view,
        transcendentals=B,
        bytes_accessed=2 * B * N_view * itemsize + B * 8 * _LANE * 4,
    )

    kernel = _make_dice_kernel(R, TR, ragged)

    per_sample = pl.pallas_call(
        kernel,
        out_shape=jax.ShapeDtypeStruct((B, 8, _LANE), jnp.float32),
        grid_spec=pltpu.PrefetchScalarGridSpec(
            num_scalar_prefetch=0,
            grid=(B, n_chunks),
            in_specs=[
                pl.BlockSpec((1, TR, _LANE), lambda b, k: (b, k, 0)),
                pl.BlockSpec((1, TR, _LANE), lambda b, k: (b, k, 0)),
            ],
            out_specs=pl.BlockSpec((1, 8, _LANE), lambda b, k: (b, 0, 0)),
            scratch_shapes=[
                pltpu.VMEM((8, _LANE), jnp.float32),
                pltpu.VMEM((8, _LANE), jnp.float32),
            ],
        ),
        compiler_params=pltpu.CompilerParams(
            dimension_semantics=("parallel", "arbitrary"),
            vmem_limit_bytes=_VMEM_LIMIT,
        ),
        cost_estimate=cost,
    )(fake_r, real_r)

    # TODO(synk): on v7x with B==1 the reduction axis could additionally be
    # split across the two TensorCores; here B is the only parallel axis.
    loss = jnp.mean(per_sample[:, 0, 0]) * jnp.float32(weight)
    return {"dice": loss}


def _reference_dice_loss(inp, tgt, weight):
    # Pure-JAX reference mirroring the PyTorch code (f32 accumulation).
    inp = inp.astype(jnp.float32)
    tgt = tgt.astype(jnp.float32)
    dims = (1, 2, 3)
    numer = jnp.sum(2.0 * inp * tgt, axis=dims)
    denom = jnp.sum(inp ** 2 + tgt ** 2, axis=dims)
    dice = numer / (denom + 1e-16)
    return -jnp.mean(jnp.log(dice + 1e-16)) * weight


if __name__ == "__main__":
    key = jax.random.PRNGKey(0)
    k1, k2, k3, k4, k5, k6 = jax.random.split(key, 6)

    weight = 0.5  # deterministic weight (Criterion.__init__ argument)

    # --- small case (module-consistent shapes): zero-copy aligned path ---
    B, C, H, W = 2, 4, 16, 16
    fake_segm = jax.random.uniform(k1, (B, C, H, W), dtype=jnp.float32)
    real_segm = jax.random.uniform(k2, (B, C, H, W), dtype=jnp.float32)
    data_dict = {"real_segm": real_segm, "fake_segm": fake_segm}

    loss_G_dict = dice_criterion(data_dict["fake_segm"],
                                 data_dict["real_segm"],
                                 weight)
    loss = jax.block_until_ready(loss_G_dict["dice"])
    ref = jax.block_until_ready(_reference_dice_loss(fake_segm, real_segm, weight))
    assert jnp.allclose(loss, ref, rtol=1e-5, atol=1e-6), (loss, ref)

    # --- ragged case: non-128-multiple N, multi-chunk accumulation, masked tail ---
    B2, C2, H2, W2 = 2, 4, 365, 365
    fake2 = jax.random.uniform(k3, (B2, C2, H2, W2), dtype=jnp.float32)
    real2 = jax.random.uniform(k4, (B2, C2, H2, W2), dtype=jnp.float32)
    loss2 = jax.block_until_ready(dice_criterion(fake2, real2, weight)["dice"])
    ref2 = jax.block_until_ready(_reference_dice_loss(fake2, real2, weight))
    assert jnp.allclose(loss2, ref2, rtol=1e-4, atol=2e-5), (loss2, ref2)

    # --- bf16 case: exercises 16-row sublane packing + in-kernel f32 cast ---
    B3, C3, H3, W3 = 2, 4, 32, 32
    fake3 = jax.random.uniform(k5, (B3, C3, H3, W3), dtype=jnp.bfloat16)
    real3 = jax.random.uniform(k6, (B3, C3, H3, W3), dtype=jnp.bfloat16)
    loss3 = jax.block_until_ready(dice_criterion(fake3, real3, weight)["dice"])
    ref3 = jax.block_until_ready(_reference_dice_loss(fake3, real3, weight))
    assert jnp.allclose(loss3, ref3, rtol=1e-4, atol=2e-5), (loss3, ref3)

    print("KERNEL_OK")
</pallas_src>

<mosaic_0001>
module attributes {stable_mosaic.version = 11 : i64} {
  func.func @kernel(%arg0: i32, %arg1: i32, %arg2: memref<1x8x128xf32, #tpu.memory_space<vmem>>, %arg3: memref<1x8x128xf32, #tpu.memory_space<vmem>>, %arg4: memref<1x8x128xf32, #tpu.memory_space<vmem>>, %arg5: memref<8x128xf32, #tpu.memory_space<vmem>>, %arg6: memref<8x128xf32, #tpu.memory_space<vmem>>) attributes {dimension_semantics = [#tpu.dimension_semantics<parallel>, #tpu.dimension_semantics<arbitrary>], iteration_bounds = array<i64: 2, 1>, scalar_prefetch = 0 : i64, scratch_operands = 2 : i64, tpu.core_type = #tpu.core_type<tc>, window_params = [{transform_indices = @transform_0, window_bounds = array<i64: 1, 8, 128>}, {transform_indices = @transform_1, window_bounds = array<i64: 1, 8, 128>}, {transform_indices = @transform_2, window_bounds = array<i64: 1, 8, 128>}]} {
    %c0_i32 = arith.constant 0 : i32
    %0 = arith.cmpi eq, %arg1, %c0_i32 : i32
    %1 = arith.extui %0 : i1 to i32
    %c0_i32_0 = arith.constant 0 : i32
    %2 = arith.cmpi ne, %1, %c0_i32_0 : i32
    scf.if %2 {
      %cst_17 = arith.constant 0.000000e+00 : f32
      %24 = vector.broadcast %cst_17 : f32 to vector<8x128xf32>
      %c0_18 = arith.constant 0 : index
      %c0_19 = arith.constant 0 : index
      %25 = vector.load %arg5[%c0_18, %c0_19] : memref<8x128xf32, #tpu.memory_space<vmem>>, vector<8x128xf32>
      tpu.vector_store %arg5[%c0_18, %c0_19], %24 {strides = array<i32>} : memref<8x128xf32, #tpu.memory_space<vmem>>, vector<8x128xf32>,
      %cst_20 = arith.constant 0.000000e+00 : f32
      %26 = vector.broadcast %cst_20 : f32 to vector<8x128xf32>
      %c0_21 = arith.constant 0 : index
      %c0_22 = arith.constant 0 : index
      %27 = vector.load %arg6[%c0_21, %c0_22] : memref<8x128xf32, #tpu.memory_space<vmem>>, vector<8x128xf32>
      tpu.vector_store %arg6[%c0_21, %c0_22], %26 {strides = array<i32>} : memref<8x128xf32, #tpu.memory_space<vmem>>, vector<8x128xf32>,
    } else {
    }
    %c0 = arith.constant 0 : index
    %c0_1 = arith.constant 0 : index
    %c0_2 = arith.constant 0 : index
    %3 = vector.load %arg2[%c0, %c0_1, %c0_2] : memref<1x8x128xf32, #tpu.memory_space<vmem>>, vector<1x8x128xf32>
    %4 = vector.shape_cast %3 : vector<1x8x128xf32> to vector<8x128xf32>
    %c0_3 = arith.constant 0 : index
    %c0_4 = arith.constant 0 : index
    %c0_5 = arith.constant 0 : index
    %5 = vector.load %arg3[%c0_3, %c0_4, %c0_5] : memref<1x8x128xf32, #tpu.memory_space<vmem>>, vector<1x8x128xf32>
    %6 = vector.shape_cast %5 : vector<1x8x128xf32> to vector<8x128xf32>
    %7 = arith.mulf %4, %6 : vector<8x128xf32>
    %8 = vector.shape_cast %7 : vector<8x128xf32> to vector<1x8x128xf32>
    %9 = arith.mulf %4, %4 : vector<8x128xf32>
    %10 = arith.mulf %6, %6 : vector<8x128xf32>
    %11 = arith.addf %9, %10 : vector<8x128xf32>
    %12 = vector.shape_cast %11 : vector<8x128xf32> to vector<1x8x128xf32>
    %c0_6 = arith.constant 0 : index
    %c0_7 = arith.constant 0 : index
    %13 = vector.load %arg5[%c0_6, %c0_7] : memref<8x128xf32, #tpu.memory_space<vmem>>, vector<8x128xf32>
    %cst = arith.constant dense<0.000000e+00> : vector<8x128xf32>
    %14 = vector.multi_reduction <add>, %8, %cst [0] : vector<1x8x128xf32> to vector<8x128xf32>
    %15 = arith.addf %13, %14 : vector<8x128xf32>
    %c0_8 = arith.constant 0 : index
    %c0_9 = arith.constant 0 : index
    %16 = vector.load %arg5[%c0_8, %c0_9] : memref<8x128xf32, #tpu.memory_space<vmem>>, vector<8x128xf32>
    tpu.vector_store %arg5[%c0_8, %c0_9], %15 {strides = array<i32>} : memref<8x128xf32, #tpu.memory_space<vmem>>, vector<8x128xf32>,
    %c0_10 = arith.constant 0 : index
    %c0_11 = arith.constant 0 : index
    %17 = vector.load %arg6[%c0_10, %c0_11] : memref<8x128xf32, #tpu.memory_space<vmem>>, vector<8x128xf32>
    %cst_12 = arith.constant dense<0.000000e+00> : vector<8x128xf32>
    %18 = vector.multi_reduction <add>, %12, %cst_12 [0] : vector<1x8x128xf32> to vector<8x128xf32>
    %19 = arith.addf %17, %18 : vector<8x128xf32>
    %c0_13 = arith.constant 0 : index
    %c0_14 = arith.constant 0 : index
    %20 = vector.load %arg6[%c0_13, %c0_14] : memref<8x128xf32, #tpu.memory_space<vmem>>, vector<8x128xf32>
    tpu.vector_store %arg6[%c0_13, %c0_14], %19 {strides = array<i32>} : memref<8x128xf32, #tpu.memory_space<vmem>>, vector<8x128xf32>,
    %c0_i32_15 = arith.constant 0 : i32
    %21 = arith.cmpi eq, %arg1, %c0_i32_15 : i32
    %22 = arith.extui %21 : i1 to i32
    %c0_i32_16 = arith.constant 0 : i32
    %23 = arith.cmpi ne, %22, %c0_i32_16 : i32
    scf.if %23 {
      %c0_17 = arith.constant 0 : index
      %c0_18 = arith.constant 0 : index
      %24 = vector.load %arg5[%c0_17, %c0_18] : memref<8x128xf32, #tpu.memory_space<vmem>>, vector<8x128xf32>
      %cst_19 = arith.constant dense<0.000000e+00> : vector<128xf32>
      %25 = vector.multi_reduction <add>, %24, %cst_19 [0] : vector<8x128xf32> to vector<128xf32>
      %26 = vector.shape_cast %25 : vector<128xf32> to vector<1x128xf32>
      %cst_20 = arith.constant dense<0.000000e+00> : vector<1xf32>
      %27 = vector.multi_reduction <add>, %26, %cst_20 [1] : vector<1x128xf32> to vector<1xf32>
      %28 = vector.shape_cast %27 : vector<1xf32> to vector<1x1xf32>
      %c0_21 = arith.constant 0 : index
      %c0_22 = arith.constant 0 : index
      %29 = vector.load %arg6[%c0_21, %c0_22] : memref<8x128xf32, #tpu.memory_space<vmem>>, vector<8x128xf32>
      %cst_23 = arith.constant dense<0.000000e+00> : vector<128xf32>
      %30 = vector.multi_reduction <add>, %29, %cst_23 [0] : vector<8x128xf32> to vector<128xf32>
      %31 = vector.shape_cast %30 : vector<128xf32> to vector<1x128xf32>
      %cst_24 = arith.constant dense<0.000000e+00> : vector<1xf32>
      %32 = vector.multi_reduction <add>, %31, %cst_24 [1] : vector<1x128xf32> to vector<1xf32>
      %33 = vector.shape_cast %32 : vector<1xf32> to vector<1x1xf32>
      %cst_25 = arith.constant 2.000000e+00 : f32
      %34 = vector.broadcast %cst_25 : f32 to vector<1x1xf32>
      %35 = arith.mulf %34, %28 : vector<1x1xf32>
      %cst_26 = arith.constant 1.000000e-16 : f32
      %36 = vector.broadcast %cst_26 : f32 to vector<1x1xf32>
      %37 = arith.addf %33, %36 : vector<1x1xf32>
      %38 = arith.divf %35, %37 : vector<1x1xf32>
      %cst_27 = arith.constant 1.000000e-16 : f32
      %39 = vector.broadcast %cst_27 : f32 to vector<1x1xf32>
      %40 = arith.addf %38, %39 : vector<1x1xf32>
      %41 = math.log %40 : vector<1x1xf32>
      %cst_28 = arith.constant 0.000000e+00 : f32
      %42 = vector.broadcast %cst_28 : f32 to vector<1x1xf32>
      %43 = arith.subf %42, %41 : vector<1x1xf32>
      %44 = vector.shape_cast %43 : vector<1x1xf32> to vector<1x1x1xf32>
      %45 = vector.broadcast %44 : vector<1x1x1xf32> to vector<1x8x128xf32>
      %c0_29 = arith.constant 0 : index
      %c0_30 = arith.constant 0 : index
      %c0_31 = arith.constant 0 : index
      %46 = vector.load %arg4[%c0_29, %c0_30, %c0_31] : memref<1x8x128xf32, #tpu.memory_space<vmem>>, vector<1x8x128xf32>
      tpu.vector_store %arg4[%c0_29, %c0_30, %c0_31], %45 {strides = array<i32>} : memref<1x8x128xf32, #tpu.memory_space<vmem>>, vector<1x8x128xf32>,
    } else {
    }
    return
  }
  func.func @transform_0(%arg0: i32, %arg1: i32) -> (i32, i32, i32) {
    %c0_i32 = arith.constant 0 : i32
    %c0_i32_0 = arith.constant 0 : i32
    return %arg0, %arg1, %c0_i32 : i32, i32, i32
  }
  func.func @transform_1(%arg0: i32, %arg1: i32) -> (i32, i32, i32) {
    %c0_i32 = arith.constant 0 : i32
    %c0_i32_0 = arith.constant 0 : i32
    return %arg0, %arg1, %c0_i32 : i32, i32, i32
  }
  func.func @transform_2(%arg0: i32, %arg1: i32) -> (i32, i32, i32) {
    %c0_i32 = arith.constant 0 : i32
    %c0_i32_0 = arith.constant 0 : i32
    %c0_i32_1 = arith.constant 0 : i32
    return %arg0, %c0_i32, %c0_i32_0 : i32, i32, i32
  }
}

</mosaic_0001>

<bundles_post_ra>
// kernel: tpu_custom_call.1
= control target key start
LH: loop header
LB: loop body
LE: loop exit
PB: predicated region body
PF: predicated region fallthrough
CT: control target
= control target key end

     0   :  { %7 = vsyncpa [#allocation5], 0  ;;  %s794_s0 = inlined_call_operand.hbm [shape: f32[2,8,128], index: 0, kind: input, shape index: {}]   ;;  %s795_s1 = inlined_call_operand.hbm [shape: f32[2,8,128], index: 1, kind: input, shape index: {}]   ;;  %s796_s2 = inlined_call_operand.hbm [shape: f32[2,8,128], index: 2, kind: output, shape index: {}]  }
   0x1   :  { %9 = vsyncpa [#allocation5 + $0x1], 0 }
   0x2   :  { %10 = vsyncpa [#allocation8], 0 }
   0x3   :  { %12 = vsyncpa [#allocation8 + $0x1], 0 }
   0x4   :  { %13 = vsyncpa [#allocation6], 0 }
   0x5   :  { %15 = vsyncpa [#allocation6 + $0x1], 0  ;;  %s628_s9 = smov 0   ;;  %s630_s10 = smov 0  }
   0x6   :  { %s632_s11 = smov 0   ;;  %s634_s12 = smov 0  }
   0x7   :  { %s636_s13 = smov 0   ;;  %s638_s14 = smov 0  }
   0x8 LB: > { %s381_s15 = sadd.s32 4294967295, %s608_s14   ;;  %s382_s16 = sadd.s32 4294967294, %s608_s14   ;;  %s608_s14 = sphi %s638_s14, %s21_s14   ;;  %s604_s13 = sphi %s636_s13, %s808_s13   ;;  %s600_s12 = sphi %s634_s12, %s807_s12   ;;  %s596_s11 = sphi %s632_s11, %s806_s11   ;;  %s592_s10 = sphi %s630_s10, %s805_s10   ;;  %s588_s9 = sphi %s628_s9, %s804_s9  }
   0x9   : > { %s33_s17 = sadd.s32 1, %s604_s13  ;;  %s42_s18 = sadd.s32 1, %s596_s11 }
   0xa   : > { %p35_p0 = scmp.ge.s32.totalorder %s33_s17, 2  ;;  %p49_p1 = scmp.ne.s32.totalorder %s596_s11, %s592_s10 }
   0xb   : > { %p50_p2 = scmp.eq.s32.totalorder %s608_s14, 0  ;;  %p55_p3 = scmp.ne.s32.totalorder %s592_s10, %s588_s9 }
   0xc   : > { %s810_s17 = smov (%p35_p0, %s33_s17), 0  ;;  %p56_p5 = scmp.eq.s32.totalorder %s381_s15, 0 }
   0xd   : > { %p669_p4 = por %p50_p2, %p49_p1  ;;  %s37_s20 = ssub.s32 %s604_s13, %s810_s17 }
   0xe   : > { %p107_p6 = scmp.eq.s32.totalorder %s381_s15, 1  ;;  %p40_p7 = scmp.eq.s32.totalorder %s37_s20, 0 }
   0xf   : > { %p675_p8 = por %p56_p5, %p55_p3  ;;  %p113_p10 = scmp.eq.s32.totalorder %s382_s16, 1 }
  0x10   : > { %p679_p9 = por %p107_p6, %p49_p1  ;;  %p414_p13 = scmp.lt.s32.totalorder %s608_s14, 2 }
  0x11   : > { %s684_s23 = scalar_select %p40_p7, %s596_s11, %s42_s18  }
  0x12   : > { %p686_p11 = por %p113_p10, %p55_p3  ;;  %s693_s25 = sand.u32 1, %s596_s11  }
  0x13   : > { %s385_s26 = sshll.u32 %s693_s25, 3  ;;  %s386_s27 = sshll.u32 %s604_s13, 7 }
  0x14   : > { %s143_s30 = scalar_lea.hbm %s794_s0, %s386_s27  ;;  %s137_s3 = scalar_lea.vmem [#allocation4], %s385_s26 }
  0x15   : > { %s145_s4 = sshll.u32 %s137_s3, 4  ;;  %p702_p0 = pnand %p414_p13, %p669_p4  ;;  %s146_s4 = int_to_ptr.vmem [resolvable:$true] %s145_s4 }
  0x16   : > { %p389_p1 = scmp.ge.s32.totalorder %s608_s14, 1  ;;  %p169_p2 = scmp.lt.s32.totalorder %s608_s14, 3 }
  0x17   : > { %s134_s6 = scalar_lea.sflag [#allocation5], %s693_s25  ;;  %p470_p3 = pneg %p702_p0 }
  0x18   : > { %s481_s7 = scalar_lea.vmem %s146_s4, 128  ;;  %s610_s8 = smov [#allocation4]  }
  0x19   : > { %p482_p5 = scmp.ne.s32.totalorder %s146_s4, %s481_s7  ;;  %s486_s15 = sshll.u32 %s610_s8, 4  ;;  %s487_s15 = int_to_ptr.vmem [resolvable:$false] %s486_s15 }
  0x1a   : > { %s488_s16 = scalar_lea.vmem %s487_s15, 256  ;;  %p489_p4 = scmp.lt.s32.totalorder %s146_s4, %s487_s15 }
  0x1b   : > { %p484_p6 = pnand %p482_p5, %p470_p3  ;;  %p490_p10 = scmp.lt.s32.totalorder %s488_s16, %s481_s7 }
  0x1d   : > { %p485_p7 = pneg %p484_p6  ;;  %p491_p13 = por %p490_p10, %p489_p4 }
  0x1f   : > { %p492_p12 = pnand %p491_p13, %p485_p7 }
  0x21   : > { %495 = shalt.err (!%p492_p12)
}
  0x22   : > { %406 = dma.hbm_to_vmem [thread:$0]  (!%p702_p0), %s143_s30, 128, %s146_s4, %s134_s6  }
  0x23   : > { %p720_p5 = pnand %p389_p1, %p169_p2  ;;  %s162_s28 = scalar_lea.hbm %s795_s1, %s386_s27 }
  0x24   : > { %s156_s29 = scalar_lea.vmem [#allocation7], %s385_s26  ;;  %s153_s7 = scalar_lea.sflag [#allocation8], %s693_s25 }
  0x25   : > { %s164_s3 = sshll.u32 %s156_s29, 4  ;;  %s611_s30 = smov [#allocation7]   ;;  %s165_s3 = int_to_ptr.vmem [resolvable:$true] %s164_s3 }
  0x26   : > { %s509_s8 = scalar_lea.vmem %s165_s3, 128  ;;  %s514_s4 = sshll.u32 %s611_s30, 4  ;;  %s515_s4 = int_to_ptr.vmem [resolvable:$false] %s514_s4 }
  0x27   : > { %p510_p12 = scmp.ne.s32.totalorder %s165_s3, %s509_s8  ;;  %s516_s6 = scalar_lea.vmem %s515_s4, 256 }
  0x28   : > { %p517_p1 = scmp.lt.s32.totalorder %s165_s3, %s515_s4  ;;  %p518_p2 = scmp.lt.s32.totalorder %s516_s6, %s509_s8 }
  0x29   : > { %p512_p6 = pnand %p510_p12, %p470_p3 }
  0x2a   : > { %p519_p4 = por %p518_p2, %p517_p1 }
  0x2b   : > { %p513_p7 = pneg %p512_p6 }
  0x2d   : > { %p520_p10 = pnand %p519_p4, %p513_p7 }
  0x2f   : > { %523 = shalt.err (!%p520_p10)
}
  0x30   : > { %409 = dma.hbm_to_vmem [thread:$0]  (!%p702_p0), %s162_s28, 128, %s165_s3, %s153_s7  }
  0x31   : > { %173 = sbr.rel (%p720_p5) target bundleno = 263 (0x107), region = 28  ;;  %s736_s25 = sand.u32 (!%p720_p5), 1, %s592_s10  }
  0x32   : > { %s739_s26 = sshll.u32 (!%p720_p5), %s736_s25, 3  ;;  %s176_s27 = scalar_lea.sflag (!%p720_p5), [#allocation5], %s736_s25 }
  0x33   : > { %s179_s15 = scalar_lea.vmem (!%p720_p5), [#allocation4], %s739_s26 }
  0x36   : > { %575 = dma.done.wait (%p675_p8), %s176_s27, 128  }
  0x37   : > { %577 = vsyncadd (%p675_p8), %s176_s27, 4294967168  ;;  %s185_s5 = scalar_lea.sflag [#allocation8], %s736_s25  ;;  %s188_s16 = scalar_lea.vmem [#allocation7], %s739_s26 }
  0x38   : > { %579 = dma.done.wait (%p675_p8), %s185_s5, 128  }
  0x39   : > { %581 = vsyncadd (%p675_p8), %s185_s5, 4294967168  ;;  %v220_v0 = vld [vmem:[%s179_s15] sm:$0xff]  ;;  %v221_v1 = vld [vmem:[%s188_s16] sm:$0xff]  ;;  %s394_s21 = sshll.u32 %s600_s12, 7  ;;  %s213_s18 = scalar_lea.vmem [#allocation9], %s739_s26 }
  0x3a   : > { %v223_v2 = vmul.f32 %v220_v0, %v220_v0  ;;  %v224_v3 = vmul.f32 %v221_v1, %v221_v1  ;;  %v222_v4 = vmul.f32 %v221_v1, %v220_v0  ;;  %s278_s19 = sshll.u32 %s213_s18, 4  ;;  %s276_s29 = scalar_lea.hbm %s796_s2, %s394_s21  ;;  %s279_s19 = int_to_ptr.vmem [resolvable:$true] %s278_s19 }
  0x3b   : > { %s265_s3 = scalar_lea.sflag [#allocation6], %s736_s25  ;;  %s524_s7 = scalar_lea.vmem %s279_s19, 128 }
  0x3c   : > { %v225_v5 = vadd.f32 %v224_v3, %v223_v2  ;;  %v238_v6 = vrot.slane %v222_v4, 4  ;;  %p525_p8 = scmp.ne.s32.totalorder %s279_s19, %s524_s7  ;;  %s612_s8 = smov [#allocation9]  }
  0x3d   : > { %s528_s30 = sshll.u32 %s612_s8, 4  ;;  %s529_s30 = int_to_ptr.vmem [resolvable:$false] %s528_s30 }
  0x3e   : > { %v247_v7 = vrot.slane %v225_v5, 4  ;;  %v239_v8 = vadd.f32 %v238_v6, %v222_v4  ;;  %p526_p0 = pnand %p525_p8, %p679_p9  ;;  %s530_s12 = scalar_lea.vmem %s529_s30, 256 }
  0x3f   : > { %p531_p13 = scmp.lt.s32.totalorder %s279_s19, %s529_s30  ;;  %p532_p5 = scmp.lt.s32.totalorder %s530_s12, %s524_s7 }
  0x40   : > { %v248_v9 = vadd.f32 %v247_v7, %v225_v5  ;;  %v240_v10 = vrot.slane %v239_v8, 2  ;;  %p527_p3 = pneg %p526_p0 }
  0x41   : > { %p533_p12 = por %p532_p5, %p531_p13 }
  0x42   : > { %v249_v11 = vrot.slane %v248_v9, 2  ;;  %v241_v12 = vadd.f32 %v240_v10, %v239_v8 }
  0x43   : > { %p534_p6 = pnand %p533_p12, %p527_p3 }
  0x44   : > { %v250_v13 = vadd.f32 %v249_v11, %v248_v9  ;;  %v242_v15 = vrot.slane %v241_v12, 1 }
  0x46   : > { %v251_v14 = vrot.slane %v250_v13, 1  ;;  %v243_v17 = vadd.f32 %v242_v15, %v241_v12 }
  0x48   : > { %v252_v16 = vadd.f32 %v251_v14, %v250_v13 }
  0x4a   : > { %253 = vadd.xlane.f32.xlu0 %v252_v16 }
  0x4e   : > { %244 = vadd.xlane.f32.xlu0 %v243_v17 }
  0xd3   : > { %v254_v18 = vpop.xlane.xlu0 %253 }
  0xd4   : > { %v256_v19 = vadd.f32 1e-16, %v254_v18 }
  0xd6   : > { %464 = vrcp.f32 %v256_v19 }
  0xd7   : > { %v245_v20 = vpop.xlane.xlu0 %244 }
  0xd8   : > { %v255_v21 = vmul.f32 2.0, %v245_v20 }
  0xe3   : > { %v465_v22 = vpop.eup %464 }
  0xe4   : > { %v258_v23 = vmul.f32 %v465_v22, %v255_v21 }
  0xe6   : > { %v259_v24 = vadd.f32 1e-16, %v258_v23 }
  0xe8   : > { %466 = vlog2.f32 %v259_v24 }
  0xf5   : > { %v467_v25 = vpop.eup %466 }
  0xf6   : > { %v261_v26 = vmul.f32 0.6931472, %v467_v25 }
  0xf8   : > { %v262_v27 = vsub.f32 0.0, %v261_v26 }
  0xfa   : > { %263 = vst [vmem:[%s213_s18] sm:$0xff] %v262_v27 }
  0xfb   : > { %537 = shalt.err (!%p534_p6)
}
  0xfc   : > { %s538_s4 = scalar_lea.hbm %s276_s29, 128  ;;  %s542_s26 = scalar_lea.hbm %s796_s2, 256 }
  0xfd   : > { %p539_p7 = scmp.ne.s32.totalorder %s276_s29, %s538_s4  ;;  %p543_p4 = scmp.lt.s32.totalorder %s276_s29, %s796_s2 }
  0xfe   : > { %p544_p10 = scmp.lt.s32.totalorder %s542_s26, %s538_s4 }
  0xff   : > { %p540_p1 = pnand %p539_p7, %p679_p9 }
 0x100   : > { %p545_p8 = por %p544_p10, %p543_p4 }
 0x101   : > { %p541_p2 = pneg %p540_p1 }
 0x103   : > { %p546_p0 = pnand %p545_p8, %p541_p2 }
 0x105   : > { %549 = shalt.err (!%p546_p0)
}
 0x106   : > { %401 = dma.vmem_to_hbm [thread:$0]  (%p679_p9), %s279_s19, 128, %s276_s29, %s265_s3  }
 0x107 PF: > { %s290_s5 = sand.u32 1, %s588_s9   ;;  %p803_p3 = scmp.ge.s32.totalorder %s608_s14, 2 }
 0x108   : > { %s291_s16 = scalar_lea.sflag [#allocation6], %s290_s5 }
 0x109   : > { %p411_p13 = pnand %p803_p3, %p686_p11 }
 0x10b   : > { %p412_p5 = pneg %p411_p13 }
 0x10d   : > { %583 = dma.done.wait (%p412_p5), %s291_s16, 128  }
 0x10e   : > { %585 = vsyncadd (%p412_p5), %s291_s16, 4294967168  ;;  %s21_s14 = sadd.s32 1, %s608_s14   ;;  %s804_s9 = smov %s592_s10 }
 0x10f   : > { %p18_p12 = scmp.ge.s32.totalorder %s21_s14, 4   ;;  %s805_s10 = smov %s596_s11 }
 0x110   : > { %s806_s11 = smov %s684_s23  ;;  %s807_s12 = smov %s604_s13 }
 0x111   : > { %s808_s13 = smov %s810_s17  ;;  %20 = sbr.rel (!%p18_p12) target bundleno = 8 (0x8), region = 94 }
 0x116   :  { %296 = vsyncpa [#allocation5], 1 }
 0x117   :  { %298 = vsyncpa [#allocation5 + $0x1], 1 }
 0x118   :  { %299 = vsyncpa [#allocation8], 1 }
 0x119   :  { %301 = vsyncpa [#allocation8 + $0x1], 1 }
 0x11a   :  { %302 = vsyncpa [#allocation6], 1 }
 0x11b   :  { %304 = vsyncpa [#allocation6 + $0x1], 1 }

</bundles_post_ra>
